<compile_context>
chip_gen: v7x
topology: tpu7x:2x2x1
jax: 0.10.0
libtpu: 0.0.40
codegen_flags: <defaults>
</compile_context>

<pallas_src>
import functools

import jax
import jax.numpy as jnp
from jax.experimental import pallas as pl
from jax.experimental.pallas import tpu as pltpu


def _round_up(x, m):
    return ((x + m - 1) // m) * m


# Edge rows per grid step.  Raised from 512 -> 2048 (review): at K=24..56 / out=16..32 the
# kernels are HBM / per-step-overhead bound, and a 2048-row tile uses only ~1.5 MiB of
# double-buffered VMEM -- far under the scoped budget on v5e/v6e/v7x.
_EDGE_TILE = 2048


def _pick_edge_tile(n_edges):
    """Largest tile <= _EDGE_TILE, but aim for >= 2 tiles so the 'parallel' edge axis can
    feed both of v7x's TensorCores; multiple of 16 so bf16 blocks are full packed
    (16, 128) sublane tiles (v5e packing note in review)."""
    half = _round_up(max(1, (n_edges + 1) // 2), 16)
    return max(16, min(_EDGE_TILE, half))


# ---------------------------------------------------------------------------
# Kernel A: per-edge message   m = relu(cat[h_src, h_edge, h_dst] @ W_msg + b_msg)
# m is internal only -> emitted bf16 to halve the dominant stage-1 write traffic.
# ---------------------------------------------------------------------------
def _msg_kernel(x1_ref, wm_ref, bm_ref, m_ref):
    acc = jnp.dot(x1_ref[...], wm_ref[...], preferred_element_type=jnp.float32)
    m_ref[...] = jnp.maximum(acc + bm_ref[...], 0.0).astype(m_ref.dtype)


# ---------------------------------------------------------------------------
# Kernel B: fused per-edge update + apply, one lane-dense [te, EO+NO] output.
#   pre[:, :EO] = [h_src|h_edge] @ W_edge_x + h_neigh @ W_edge_h + b_edge
#   pre[:, EO:] = h_dst @ Wa_d + h_neigh @ Wa_h + b_apply
#   eh    = relu(pre[:, :EO])
#   m_out = pre[:, EO:] + eh @ Wa_eo
# Implemented with a lane mask + a zero-padded Wa_eo so no minor-dim slicing /
# concatenation (and no extra masked 16-lane stores) is needed in-kernel.
# ---------------------------------------------------------------------------
def _edge_kernel(eo, x1_ref, hn_ref, w2x_ref, w2h_ref, b2_ref, waeo_ref, out_ref):
    f32 = jnp.float32
    pre = (jnp.dot(x1_ref[...], w2x_ref[...], preferred_element_type=f32)
           + jnp.dot(hn_ref[...], w2h_ref[...], preferred_element_type=f32)
           + b2_ref[...])
    col = jax.lax.broadcasted_iota(jnp.int32, pre.shape, 1)
    is_eh = col < eo
    out = jnp.where(is_eh, jnp.maximum(pre, 0.0), pre)   # relu only on the eh lanes
    eh_z = jnp.where(is_eh, out, 0.0)                    # eh in lanes [:eo], zeros elsewhere
    # waeo_ref is [EO+NO, EO+NO] with Wa_eo at rows [:EO] x cols [EO:]; this adds
    # eh @ Wa_eo into the m_out lanes and nothing into the eh lanes.  Kept f32 so the
    # eh @ Wa_eo product matches the pure-f32 reference (no extra bf16 rounding of eh).
    out_ref[...] = out + jnp.dot(eh_z, waeo_ref[...], preferred_element_type=f32)


@functools.partial(jax.jit, static_argnames=("n_dst",))
def gnn_layer_forward(src_feats, dst_feats, efeats, src_idx, dst_idx, params, n_dst):
    """Forward pass.  Graph indexing glue (endpoint gather, segment-mean) is linear-cost
    XLA; all matmul/activation work runs inside edge-tiled Pallas kernels."""
    (W_msg, b_msg, W_edge, b_edge, Wa_dh, Wa_eo, b_apply) = params

    E = efeats.shape[0]
    S = src_feats.shape[1]
    D = dst_feats.shape[1]
    Ed = efeats.shape[1]
    H = W_msg.shape[1]
    EO = W_edge.shape[1]
    NO = Wa_dh.shape[1]
    K1 = S + Ed + D
    bf16 = jnp.bfloat16
    f32 = jnp.float32

    te = _pick_edge_tile(E)
    n_tiles = pl.cdiv(E, te)       # partial last tile is masked by Pallas (no padding passes)
    cparams = pltpu.CompilerParams(dimension_semantics=("parallel",))

    # --- per-edge endpoint gather (linear-cost XLA glue), bf16 end-to-end ---------------
    xs = jnp.take(src_feats.astype(bf16), src_idx, axis=0)            # [E, S]
    xd = jnp.take(dst_feats.astype(bf16), dst_idx, axis=0)            # [E, D]
    x1 = jnp.concatenate([xs, efeats.astype(bf16), xd], axis=1)       # [E, K1], shared by both stages

    # --- weights: bf16 for the MXU (f32 accumulation); biases stay f32 ------------------
    W_msg_b = W_msg.astype(bf16)                                      # [K1, H]
    # stage 2: row-split + zero-pad W_edge / Wa_dh to x1's column layout [xs|ef|xd], and
    # stack the EO and NO outputs along the lane axis -> one lane-dense output block.
    W2_x1 = jnp.concatenate(
        [jnp.concatenate([W_edge[:S + Ed], jnp.zeros((D, EO), f32)], axis=0),
         jnp.concatenate([jnp.zeros((S + Ed, NO), f32), Wa_dh[:D]], axis=0)],
        axis=1).astype(bf16)                                          # [K1, EO+NO]
    W2_hn = jnp.concatenate([W_edge[S + Ed:], Wa_dh[D:]], axis=1).astype(bf16)   # [H, EO+NO]
    b2 = jnp.concatenate([b_edge, b_apply], axis=1)                   # [1, EO+NO]
    Wa_eo_pad = jnp.zeros((EO + NO, EO + NO), f32).at[:EO, EO:].set(Wa_eo)       # f32 on purpose

    # --- stage 1: per-edge messages ------------------------------------------------------
    m = pl.pallas_call(
        _msg_kernel,
        out_shape=jax.ShapeDtypeStruct((E, H), bf16),
        grid=(n_tiles,),
        in_specs=[pl.BlockSpec((te, K1), lambda i: (i, 0)),
                  pl.BlockSpec((K1, H), lambda i: (0, 0)),     # VMEM-resident weight
                  pl.BlockSpec((1, H), lambda i: (0, 0))],     # VMEM-resident bias
        out_specs=pl.BlockSpec((te, H), lambda i: (i, 0)),
        compiler_params=cparams,
        cost_estimate=pl.CostEstimate(
            flops=2 * E * K1 * H, transcendentals=0,
            bytes_accessed=E * (K1 + H) * 2 + K1 * H * 2 + H * 4),
    )(x1, W_msg_b, b_msg)

    # --- segment mean over incoming edges + gather back to edges -------------------------
    # TODO(synk): fold the segment-mean/gather into the kernels via dst-sorted edges and
    # scalar-prefetched per-dst edge offsets (ragged blocks); kept as linear-cost XLA glue.
    deg = jax.ops.segment_sum(jnp.ones((E,), f32), dst_idx, num_segments=n_dst)
    inv_deg = 1.0 / jnp.maximum(deg, 1.0)
    h_neigh = jax.ops.segment_sum(m.astype(f32), dst_idx, num_segments=n_dst) * inv_deg[:, None]
    hn_e = jnp.take(h_neigh.astype(bf16), dst_idx, axis=0)            # [E, H]

    # --- stage 2: per-edge update (eh) + apply (m_out), fused, single lane-dense output --
    out2 = pl.pallas_call(
        functools.partial(_edge_kernel, EO),
        out_shape=jax.ShapeDtypeStruct((E, EO + NO), f32),
        grid=(n_tiles,),
        in_specs=[pl.BlockSpec((te, K1), lambda i: (i, 0)),           # shared feature slab
                  pl.BlockSpec((te, H), lambda i: (i, 0)),            # h_neigh per edge
                  pl.BlockSpec((K1, EO + NO), lambda i: (0, 0)),      # resident weights...
                  pl.BlockSpec((H, EO + NO), lambda i: (0, 0)),
                  pl.BlockSpec((1, EO + NO), lambda i: (0, 0)),
                  pl.BlockSpec((EO + NO, EO + NO), lambda i: (0, 0))],
        out_specs=pl.BlockSpec((te, EO + NO), lambda i: (i, 0)),
        compiler_params=cparams,
        cost_estimate=pl.CostEstimate(
            flops=2 * E * ((K1 + H) * (EO + NO) + (EO + NO) * (EO + NO)),
            transcendentals=0,
            bytes_accessed=E * ((K1 + H) * 2 + (EO + NO) * 4)
                           + (K1 + H) * (EO + NO) * 2 + (EO + NO) * (EO + NO + 1) * 4),
    )(x1, hn_e, W2_x1, W2_hn, b2, Wa_eo_pad)

    eh = out2[:, :EO]                                                 # [E, EO] (f32, module output)
    m_out = out2[:, EO:]                                              # [E, NO]

    # --- final segment mean -> per-dst-node output ----------------------------------------
    h_out = jax.ops.segment_sum(m_out, dst_idx, num_segments=n_dst) * inv_deg[:, None]
    return h_out, eh


def init_params(key, source_dim, dest_dim, edge_dim, hidden_dim, ndim_out, edim_out):
    """Deterministic torch-nn.Linear-style init.  Weights stored as [in, out]
    (i.e. W^T of torch's [out, in]); W_apply is pre-split along its input dim
    into the [dst|h_neigh] block and the [eh] block."""
    ks = jax.random.split(key, 6)

    def lin(k, fan_in, shape):
        bound = 1.0 / jnp.sqrt(fan_in)
        return jax.random.uniform(k, shape, jnp.float32, -bound, bound)

    in_msg = source_dim + edge_dim + dest_dim
    in_edge = source_dim + edge_dim + hidden_dim
    in_apply = dest_dim + hidden_dim + edim_out

    W_msg = lin(ks[0], in_msg, (in_msg, hidden_dim))
    b_msg = lin(ks[1], in_msg, (1, hidden_dim))

    W_edge = lin(ks[2], in_edge, (in_edge, edim_out))
    b_edge = lin(ks[3], in_edge, (1, edim_out))

    W_apply = lin(ks[4], in_apply, (in_apply, ndim_out))
    b_apply = lin(ks[5], in_apply, (1, ndim_out))
    Wa_dh = W_apply[: dest_dim + hidden_dim]
    Wa_eo = W_apply[dest_dim + hidden_dim:]

    return (W_msg, b_msg, W_edge, b_edge, Wa_dh, Wa_eo, b_apply)


def reference_forward(src_feats, dst_feats, efeats, src_idx, dst_idx, params, n_dst):
    """Pure-JAX f32 reference mirroring the DGL/torch forward, for validation."""
    (W_msg, b_msg, W_edge, b_edge, Wa_dh, Wa_eo, b_apply) = params
    xs = src_feats[src_idx]
    xd = dst_feats[dst_idx]
    m = jax.nn.relu(jnp.concatenate([xs, efeats, xd], 1) @ W_msg + b_msg)
    deg = jax.ops.segment_sum(jnp.ones((m.shape[0],)), dst_idx, num_segments=n_dst)
    h_neigh = jax.ops.segment_sum(m, dst_idx, num_segments=n_dst) / jnp.maximum(deg, 1.0)[:, None]
    hn_e = h_neigh[dst_idx]
    eh = jax.nn.relu(jnp.concatenate([xs, efeats, hn_e], 1) @ W_edge + b_edge)
    m_out = jnp.concatenate([xd, hn_e], 1) @ Wa_dh + eh @ Wa_eo + b_apply
    h_out = jax.ops.segment_sum(m_out, dst_idx, num_segments=n_dst) / jnp.maximum(deg, 1.0)[:, None]
    return h_out, eh


if __name__ == "__main__":
    # small synthetic graph
    N_SRC, N_DST, E = 8, 8, 32
    SOURCE_DIM, DEST_DIM, EDGE_DIM = 8, 8, 8
    HIDDEN_DIM, NDIM_OUT, EDIM_OUT = 32, 16, 16

    key = jax.random.PRNGKey(0)
    k_src, k_dst, k_e, k_si, k_di, k_p = jax.random.split(key, 6)

    src_feats = jax.random.normal(k_src, (N_SRC, SOURCE_DIM), jnp.float32)
    dst_feats = jax.random.normal(k_dst, (N_DST, DEST_DIM), jnp.float32)
    efeats = jax.random.normal(k_e, (E, EDGE_DIM), jnp.float32)
    src_idx = jax.random.randint(k_si, (E,), 0, N_SRC)
    dst_idx = jax.random.randint(k_di, (E,), 0, N_DST)

    params = init_params(k_p, SOURCE_DIM, DEST_DIM, EDGE_DIM,
                         HIDDEN_DIM, NDIM_OUT, EDIM_OUT)

    h_out, eh = gnn_layer_forward(src_feats, dst_feats, efeats,
                                  src_idx, dst_idx, params, N_DST)
    jax.block_until_ready((h_out, eh))

    # Reference on bf16-rounded inputs / MXU weights (kernel is bf16-in, f32-accumulate;
    # Wa_eo stays f32 in the kernel so it is NOT rounded here).  Tolerance covers the
    # kernel's additional bf16 rounding of the internal m / h_neigh intermediates.
    def _r(x):
        return x.astype(jnp.bfloat16).astype(jnp.float32)

    (W_msg, b_msg, W_edge, b_edge, Wa_dh, Wa_eo, b_apply) = params
    ref_params = (_r(W_msg), b_msg, _r(W_edge), b_edge, _r(Wa_dh), Wa_eo, b_apply)
    h_ref, eh_ref = reference_forward(_r(src_feats), _r(dst_feats), _r(efeats),
                                      src_idx, dst_idx, ref_params, N_DST)

    assert jnp.allclose(h_out, h_ref, atol=3e-2, rtol=2e-2)
    assert jnp.allclose(eh, eh_ref, atol=3e-2, rtol=2e-2)

    print("KERNEL_OK")
</pallas_src>

<mosaic_0001>
module attributes {stable_mosaic.version = 11 : i64} {
  func.func private @main(%arg0: i32) attributes {dimension_semantics = [#tpu.dimension_semantics<core_parallel>], iteration_bounds = array<i64: 2>, tpu.core_type = #tpu.core_type<sc_scalar_subcore>, window_params = []} {
    return
  }
}

module attributes {stable_mosaic.version = 11 : i64} {
  func.func private @main(%arg0: i32) attributes {dimension_semantics = [#tpu.dimension_semantics<core_parallel>], iteration_bounds = array<i64: 2>, tpu.core_type = #tpu.core_type<sc_scalar_subcore>, window_params = []} {
    return
  }
}

module attributes {stable_mosaic.version = 11 : i64} {
  func.func @_msg_kernel(%arg0: i32, %arg1: memref<16x24xbf16, #tpu.memory_space<vmem>>, %arg2: memref<24x32xbf16, #tpu.memory_space<vmem>>, %arg3: memref<1x32xf32, #tpu.memory_space<vmem>>, %arg4: memref<16x32xbf16, #tpu.memory_space<vmem>>) attributes {dimension_semantics = [#tpu.dimension_semantics<parallel>], iteration_bounds = array<i64: 2>, scalar_prefetch = 0 : i64, scratch_operands = 0 : i64, tpu.core_type = #tpu.core_type<tc>, window_params = [{transform_indices = @transform_0, window_bounds = array<i64: 16, 24>}, {pipeline_mode = #tpu.pipeline_mode<synchronous>, transform_indices = @transform_1, window_bounds = array<i64: 24, 32>}, {pipeline_mode = #tpu.pipeline_mode<synchronous>, transform_indices = @transform_2, window_bounds = array<i64: 1, 32>}, {transform_indices = @transform_3, window_bounds = array<i64: 16, 32>}]} {
    %c0 = arith.constant 0 : index
    %c0_0 = arith.constant 0 : index
    %0 = vector.load %arg1[%c0, %c0_0] : memref<16x24xbf16, #tpu.memory_space<vmem>>, vector<16x24xbf16>
    %c0_1 = arith.constant 0 : index
    %c0_2 = arith.constant 0 : index
    %1 = vector.load %arg2[%c0_1, %c0_2] : memref<24x32xbf16, #tpu.memory_space<vmem>>, vector<24x32xbf16>
    %cst = arith.constant dense<0.000000e+00> : vector<16x32xf32>
    %2 = tpu.matmul %0, %1, %cst {dimension_numbers = #tpu.dot_dimension_numbers<[1], [0], [0], [1], [0, 0, 1, 1], [], []>} : vector<16x24xbf16>, vector<24x32xbf16>, vector<16x32xf32> -> vector<16x32xf32>
    %c0_3 = arith.constant 0 : index
    %c0_4 = arith.constant 0 : index
    %3 = vector.load %arg3[%c0_3, %c0_4] : memref<1x32xf32, #tpu.memory_space<vmem>>, vector<1x32xf32>
    %4 = vector.broadcast %3 : vector<1x32xf32> to vector<16x32xf32>
    %5 = arith.addf %2, %4 : vector<16x32xf32>
    %cst_5 = arith.constant 0.000000e+00 : f32
    %6 = vector.broadcast %cst_5 : f32 to vector<16x32xf32>
    %7 = arith.maximumf %5, %6 : vector<16x32xf32>
    %8 = arith.truncf %7 : vector<16x32xf32> to vector<16x32xbf16>
    %c0_6 = arith.constant 0 : index
    %c0_7 = arith.constant 0 : index
    %9 = vector.load %arg4[%c0_6, %c0_7] : memref<16x32xbf16, #tpu.memory_space<vmem>>, vector<16x32xbf16>
    tpu.vector_store %arg4[%c0_6, %c0_7], %8 {strides = array<i32>} : memref<16x32xbf16, #tpu.memory_space<vmem>>, vector<16x32xbf16>,
    return
  }
  func.func @transform_0(%arg0: i32) -> (i32, i32) {
    %c0_i32 = arith.constant 0 : i32
    %c0_i32_0 = arith.constant 0 : i32
    return %arg0, %c0_i32 : i32, i32
  }
  func.func @transform_1(%arg0: i32) -> (i32, i32) {
    %c0_i32 = arith.constant 0 : i32
    %c0_i32_0 = arith.constant 0 : i32
    %c0_i32_1 = arith.constant 0 : i32
    return %c0_i32, %c0_i32_0 : i32, i32
  }
  func.func @transform_2(%arg0: i32) -> (i32, i32) {
    %c0_i32 = arith.constant 0 : i32
    %c0_i32_0 = arith.constant 0 : i32
    %c0_i32_1 = arith.constant 0 : i32
    return %c0_i32, %c0_i32_0 : i32, i32
  }
  func.func @transform_3(%arg0: i32) -> (i32, i32) {
    %c0_i32 = arith.constant 0 : i32
    %c0_i32_0 = arith.constant 0 : i32
    return %arg0, %c0_i32 : i32, i32
  }
}

module attributes {stable_mosaic.version = 11 : i64} {
  func.func @_edge_kernel(%arg0: i32, %arg1: memref<16x24xbf16, #tpu.memory_space<vmem>>, %arg2: memref<16x32xbf16, #tpu.memory_space<vmem>>, %arg3: memref<24x32xbf16, #tpu.memory_space<vmem>>, %arg4: memref<32x32xbf16, #tpu.memory_space<vmem>>, %arg5: memref<1x32xf32, #tpu.memory_space<vmem>>, %arg6: memref<32x32xf32, #tpu.memory_space<vmem>>, %arg7: memref<16x32xf32, #tpu.memory_space<vmem>>) attributes {dimension_semantics = [#tpu.dimension_semantics<parallel>], iteration_bounds = array<i64: 2>, scalar_prefetch = 0 : i64, scratch_operands = 0 : i64, tpu.core_type = #tpu.core_type<tc>, window_params = [{transform_indices = @transform_0, window_bounds = array<i64: 16, 24>}, {transform_indices = @transform_1, window_bounds = array<i64: 16, 32>}, {pipeline_mode = #tpu.pipeline_mode<synchronous>, transform_indices = @transform_2, window_bounds = array<i64: 24, 32>}, {pipeline_mode = #tpu.pipeline_mode<synchronous>, transform_indices = @transform_3, window_bounds = array<i64: 32, 32>}, {pipeline_mode = #tpu.pipeline_mode<synchronous>, transform_indices = @transform_4, window_bounds = array<i64: 1, 32>}, {pipeline_mode = #tpu.pipeline_mode<synchronous>, transform_indices = @transform_5, window_bounds = array<i64: 32, 32>}, {transform_indices = @transform_6, window_bounds = array<i64: 16, 32>}]} {
    %c0 = arith.constant 0 : index
    %c0_0 = arith.constant 0 : index
    %0 = vector.load %arg1[%c0, %c0_0] : memref<16x24xbf16, #tpu.memory_space<vmem>>, vector<16x24xbf16>
    %c0_1 = arith.constant 0 : index
    %c0_2 = arith.constant 0 : index
    %1 = vector.load %arg3[%c0_1, %c0_2] : memref<24x32xbf16, #tpu.memory_space<vmem>>, vector<24x32xbf16>
    %cst = arith.constant dense<0.000000e+00> : vector<16x32xf32>
    %2 = tpu.matmul %0, %1, %cst {dimension_numbers = #tpu.dot_dimension_numbers<[1], [0], [0], [1], [0, 0, 1, 1], [], []>} : vector<16x24xbf16>, vector<24x32xbf16>, vector<16x32xf32> -> vector<16x32xf32>
    %c0_3 = arith.constant 0 : index
    %c0_4 = arith.constant 0 : index
    %3 = vector.load %arg2[%c0_3, %c0_4] : memref<16x32xbf16, #tpu.memory_space<vmem>>, vector<16x32xbf16>
    %c0_5 = arith.constant 0 : index
    %c0_6 = arith.constant 0 : index
    %4 = vector.load %arg4[%c0_5, %c0_6] : memref<32x32xbf16, #tpu.memory_space<vmem>>, vector<32x32xbf16>
    %cst_7 = arith.constant dense<0.000000e+00> : vector<16x32xf32>
    %5 = tpu.matmul %3, %4, %cst_7 {dimension_numbers = #tpu.dot_dimension_numbers<[1], [0], [0], [1], [0, 0, 1, 1], [], []>} : vector<16x32xbf16>, vector<32x32xbf16>, vector<16x32xf32> -> vector<16x32xf32>
    %6 = arith.addf %2, %5 : vector<16x32xf32>
    %c0_8 = arith.constant 0 : index
    %c0_9 = arith.constant 0 : index
    %7 = vector.load %arg5[%c0_8, %c0_9] : memref<1x32xf32, #tpu.memory_space<vmem>>, vector<1x32xf32>
    %8 = vector.broadcast %7 : vector<1x32xf32> to vector<16x32xf32>
    %9 = arith.addf %6, %8 : vector<16x32xf32>
    %10 = tpu.iota {dimensions = array<i32: 1>} : vector<16x32xi32>
    %c16_i32 = arith.constant 16 : i32
    %11 = vector.broadcast %c16_i32 : i32 to vector<16x32xi32>
    %12 = arith.cmpi slt, %10, %11 : vector<16x32xi32>
    %cst_10 = arith.constant 0.000000e+00 : f32
    %13 = vector.broadcast %cst_10 : f32 to vector<16x32xf32>
    %14 = arith.maximumf %9, %13 : vector<16x32xf32>
    %15 = arith.select %12, %14, %9 : vector<16x32xi1>, vector<16x32xf32>
    %cst_11 = arith.constant 0.000000e+00 : f32
    %16 = vector.broadcast %cst_11 : f32 to vector<16x32xf32>
    %17 = arith.select %12, %15, %16 : vector<16x32xi1>, vector<16x32xf32>
    %c0_12 = arith.constant 0 : index
    %c0_13 = arith.constant 0 : index
    %18 = vector.load %arg6[%c0_12, %c0_13] : memref<32x32xf32, #tpu.memory_space<vmem>>, vector<32x32xf32>
    %cst_14 = arith.constant dense<0.000000e+00> : vector<16x32xf32>
    %19 = tpu.matmul %17, %18, %cst_14 {dimension_numbers = #tpu.dot_dimension_numbers<[1], [0], [0], [1], [0, 0, 1, 1], [], []>} : vector<16x32xf32>, vector<32x32xf32>, vector<16x32xf32> -> vector<16x32xf32>
    %20 = arith.addf %15, %19 : vector<16x32xf32>
    %c0_15 = arith.constant 0 : index
    %c0_16 = arith.constant 0 : index
    %21 = vector.load %arg7[%c0_15, %c0_16] : memref<16x32xf32, #tpu.memory_space<vmem>>, vector<16x32xf32>
    tpu.vector_store %arg7[%c0_15, %c0_16], %20 {strides = array<i32>} : memref<16x32xf32, #tpu.memory_space<vmem>>, vector<16x32xf32>,
    return
  }
  func.func @transform_0(%arg0: i32) -> (i32, i32) {
    %c0_i32 = arith.constant 0 : i32
    %c0_i32_0 = arith.constant 0 : i32
    return %arg0, %c0_i32 : i32, i32
  }
  func.func @transform_1(%arg0: i32) -> (i32, i32) {
    %c0_i32 = arith.constant 0 : i32
    %c0_i32_0 = arith.constant 0 : i32
    return %arg0, %c0_i32 : i32, i32
  }
  func.func @transform_2(%arg0: i32) -> (i32, i32) {
    %c0_i32 = arith.constant 0 : i32
    %c0_i32_0 = arith.constant 0 : i32
    %c0_i32_1 = arith.constant 0 : i32
    return %c0_i32, %c0_i32_0 : i32, i32
  }
  func.func @transform_3(%arg0: i32) -> (i32, i32) {
    %c0_i32 = arith.constant 0 : i32
    %c0_i32_0 = arith.constant 0 : i32
    %c0_i32_1 = arith.constant 0 : i32
    return %c0_i32, %c0_i32_0 : i32, i32
  }
  func.func @transform_4(%arg0: i32) -> (i32, i32) {
    %c0_i32 = arith.constant 0 : i32
    %c0_i32_0 = arith.constant 0 : i32
    %c0_i32_1 = arith.constant 0 : i32
    return %c0_i32, %c0_i32_0 : i32, i32
  }
  func.func @transform_5(%arg0: i32) -> (i32, i32) {
    %c0_i32 = arith.constant 0 : i32
    %c0_i32_0 = arith.constant 0 : i32
    %c0_i32_1 = arith.constant 0 : i32
    return %c0_i32, %c0_i32_0 : i32, i32
  }
  func.func @transform_6(%arg0: i32) -> (i32, i32) {
    %c0_i32 = arith.constant 0 : i32
    %c0_i32_0 = arith.constant 0 : i32
    return %arg0, %c0_i32 : i32, i32
  }
}

</mosaic_0001>

<bundles_post_ra>
// kernel: gnn_layer_forward.2
= control target key start
LH: loop header
LB: loop body
LE: loop exit
PB: predicated region body
PF: predicated region fallthrough
CT: control target
= control target key end

     0   :  { %s393_s12 = smov 0   ;;  %s419_s0 = inlined_call_operand.vmem [shape: bf16[32,24], index: 0, kind: input, shape index: {}]   ;;  %s420_s1 = inlined_call_operand.vmem [shape: bf16[24,32], index: 1, kind: input, shape index: {}]   ;;  %s421_s2 = inlined_call_operand.vmem [shape: f32[1,32], index: 2, kind: input, shape index: {}]   ;;  %s422_s3 = inlined_call_operand.vmem [shape: bf16[32,32], index: 3, kind: output, shape index: {}]  }
   0x1 LB: > { %s319_s13 = sadd.s32 4294967295, %s369_s12   ;;  %p323_p0 = scmp.ge.s32.totalorder %s369_s12, 1  ;;  %s369_s12 = sphi %s393_s12, %s13_s12  }
   0x2   : > { %p138_p1 = scmp.lt.s32.totalorder %s369_s12, 3 }
   0x4   : > { %p139_p2 = pnand %p323_p0, %p138_p1 }
   0x5   : > { %v360_v0 = vld [vmem:[%s420_s1] sm:$0xff] (!%p139_p2)   ;;  %v371_v1 = vmov (!%p139_p2), 0.0   ;;  %v361_v2 = vld [vmem:[%s420_s1 + $0x8] ss:$0 sps:$4 sm:$0xff] (!%p139_p2)   ;;  %vm205_vm0 = vcmask (!%p139_p2), 1043456   ;;  %vm372_vm1 = vmmov (!%p139_p2), 0  }
   0x6   : > { %142 = sbr.rel (%p139_p2) target bundleno = 238 (0xee), region = 32  ;;  %342 = vmatprep.subr.bf16.mxu0 (!%p139_p2), %v371_v1  ;;  %346 = vmatprep.mubr.msk.bf16.mxu0 (!%p139_p2), %vm372_vm1, %v371_v1  ;;  %s324_s18 = sshll.u32 (!%p139_p2), %s319_s13, 1  ;;  %v207_v3 = vsel (!%p139_p2), %vm205_vm0, %v361_v2, 0  ;;  %vm201_vm2 = vcmask (!%p139_p2), 195584   ;;  %v328_v5 = vld [vmem:[%s421_s2] ss:$0 sm:$0xff] (!%p139_p2) }
   0x7   : > { %343 = vmatpush3.bf16.msra.mxu0 (!%p139_p2), %v360_v0  ;;  %p163_p3 = scmp.lt.s32.totalorder (!%p139_p2), %s324_s18, 3  ;;  %vm260_vm3 = vcmask (!%p139_p2), 257024  }
   0x8   : > { %344 = vmatprep.subr.bf16.mxu0 (!%p139_p2), %v371_v1 }
   0xb   : > { %345 = vmatpush3.bf16.msra.mxu0 (!%p139_p2), %v207_v3 }
   0xd   : > { %s424_s18 = smov (!%p163_p3, %s324_s18), 3 }
   0xe   : > { %s325_s19 = sshll.u32 %s424_s18, 2 }
   0xf   : > { %s166_s22 = scalar_lea.vmem %s419_s0, %s325_s19  ;;  %s172_s27 = scalar_lea.vmem %s422_s3, %s325_s19 }
  0x10   : > { %v362_v4 = vld [vmem:[%s166_s22] sm:$0xff]  }
  0x11   : > { %347 = vmatmul.mubr.msk.bf16.vlgmr.msra.gmra.mrb[0].mxu0 %vm201_vm2, %v362_v4 }
  0xe4   : > { %v243_v6 = vpop.f32.mrb[0].mxu0 }
  0xe5   : > { %v244_v7 = vadd.f32 %v328_v5, %v243_v6  ;;  %v348_v8 = vpop.f32.mrb[1].mxu0 }
  0xe6   : > { %v246_v9 = vpop.f32.mrb[2].mxu0 }
  0xe7   : > { %v250_v10 = vmax.f32 %v244_v7, 0.0  ;;  %v247_v11 = vadd.f32 %v328_v5, %v246_v9  ;;  %v349_v12 = vpop.f32.mrb[3].mxu0 }
  0xe9   : > { %v337_v13 = vpack.c.bf16 %v250_v10, %v250_v10  ;;  %v251_v14 = vmax.f32 %v247_v11, 0.0 }
  0xeb   : > { %261 = vst.msk [vmem:[%s172_s27] sm:$0xf] %vm260_vm3, %v337_v13  ;;  %v338_v15 = vpack.c.bf16 %v251_v14, %v251_v14 }
  0xed   : > { %262 = vst.msk [vmem:[%s172_s27 + $0x4] sm:$0xf] %vm260_vm3, %v338_v15 }
  0xee PF: > { %s13_s12 = sadd.s32 1, %s369_s12  }
  0xef   : > { %p10_p4 = scmp.ge.s32.totalorder %s13_s12, 4  }
  0xf1   :  { %12 = sbr.rel (!%p10_p4) target bundleno = 1 (0x1), region = 62 }

// kernel: gnn_layer_forward.3
= control target key start
LH: loop header
LB: loop body
LE: loop exit
PB: predicated region body
PF: predicated region fallthrough
CT: control target
= control target key end

     0   :  { %s721_s21 = smov 0   ;;  %s777_s0 = inlined_call_operand.vmem [shape: bf16[32,24], index: 0, kind: input, shape index: {}]   ;;  %s778_s1 = inlined_call_operand.vmem [shape: bf16[32,32], index: 1, kind: input, shape index: {}]   ;;  %s779_s2 = inlined_call_operand.vmem [shape: bf16[24,32], index: 2, kind: input, shape index: {}]   ;;  %s780_s3 = inlined_call_operand.vmem [shape: bf16[32,32], index: 3, kind: input, shape index: {}]   ;;  %s781_s4 = inlined_call_operand.vmem [shape: f32[1,32], index: 4, kind: input, shape index: {}]   ;;  %s782_s5 = inlined_call_operand.vmem [shape: f32[32,32], index: 5, kind: input, shape index: {}]   ;;  %s783_s6 = inlined_call_operand.vmem [shape: f32[32,32], index: 6, kind: output, shape index: {}]  }
   0x1 LB: > { %s589_s22 = sadd.s32 4294967295, %s682_s21   ;;  %p593_p0 = scmp.ge.s32.totalorder %s682_s21, 1  ;;  %s682_s21 = sphi %s721_s21, %s16_s21  }
   0x2   : > { %p224_p1 = scmp.lt.s32.totalorder %s682_s21, 3 }
   0x4   : > { %p225_p2 = pnand %p593_p0, %p224_p1 }
   0x5   : > { %v670_v0 = vld [vmem:[%s780_s3] sm:$0xff] (!%p225_p2)   ;;  %v684_v1 = vmov (!%p225_p2), 0.0   ;;  %vm369_vm0 = vcmask (!%p225_p2), 1043456   ;;  %v672_v3 = vld [vmem:[%s780_s3 + $0x8] sm:$0xff] (!%p225_p2)   ;;  %s594_s7 = sshll.u32 (!%p225_p2), %s589_s22, 1  ;;  %vm685_vm1 = vmmov (!%p225_p2), 0   ;;  %v423_v14 = vlaneseq (!%p225_p2) }
   0x6   : > { %228 = sbr.rel (%p225_p2) target bundleno = 455 (0x1c7), region = 44  ;;  %625 = vmatprep.subr.bf16.mxu0 (!%p225_p2), %v684_v1  ;;  %633 = vmatprep.subr.bf16.mxu1 (!%p225_p2), %v684_v1  ;;  %v671_v2 = vld [vmem:[%s779_s2] sm:$0xff] (!%p225_p2)   ;;  %v673_v4 = vld [vmem:[%s779_s2 + $0x8] ss:$0 sps:$4 sm:$0xff] (!%p225_p2)   ;;  %p260_p3 = scmp.lt.s32.totalorder (!%p225_p2), %s594_s7, 3  ;;  %vm306_vm2 = vcmask (!%p225_p2), 261120  }
   0x7   : > { %626 = vmatpush3.bf16.msra.mxu0 (!%p225_p2), %v670_v0  ;;  %634 = vmatpush3.bf16.msra.mxu1 (!%p225_p2), %v671_v2  ;;  %v371_v5 = vsel (!%p225_p2), %vm369_vm0, %v673_v4, 0  ;;  %vm365_vm3 = vcmask (!%p225_p2), 195584   ;;  %v432_v8 = vld [vmem:[%s782_s5] sm:$0xff] (!%p225_p2)  ;;  %v433_v9 = vld [vmem:[%s782_s5 + $0x8] sm:$0xff] (!%p225_p2)  ;;  %v434_v11 = vld [vmem:[%s782_s5 + $0x10] sm:$0xff] (!%p225_p2)  ;;  %v424_v19 = vand.u32 (!%p225_p2), 127, %v423_v14 }
   0x8   : > { %627 = vmatprep.subr.bf16.mxu0 (!%p225_p2), %v684_v1  ;;  %635 = vmatprep.subr.bf16.mxu1 (!%p225_p2), %v684_v1  ;;  %v652_v10 = vpack.c.bf16 (!%p225_p2), %v433_v9, %v432_v8  ;;  %v435_v12 = vld [vmem:[%s782_s5 + $0x18] sm:$0xff] (!%p225_p2)  ;;  %v608_v17 = vld [vmem:[%s781_s4] ss:$0 sm:$0xff] (!%p225_p2) }
   0x9   : > { %629 = vmatprep.mubr.msk.bf16.mxu0 (!%p225_p2), %vm685_vm1, %v684_v1  ;;  %637 = vmatprep.mubr.msk.bf16.mxu1 (!%p225_p2), %vm685_vm1, %v684_v1  ;;  %v656_v13 = vpack.c.bf16 (!%p225_p2), %v435_v12, %v434_v11  ;;  %vm425_vm4 = vcmp.lt.s32.totalorder (!%p225_p2), %v424_v19, 16 }
   0xb   : > { %628 = vmatpush3.bf16.msra.mxu0 (!%p225_p2), %v672_v3  ;;  %636 = vmatpush3.bf16.msra.mxu1 (!%p225_p2), %v371_v5 }
   0xc   : > { %653 = vmatprep.subr.bf16.mxu0 (!%p225_p2), %v652_v10 }
   0xd   : > { %s785_s7 = smov (!%p260_p3, %s594_s7), 3 }
   0xe   : > { %s595_s8 = sshll.u32 %s785_s7, 2  ;;  %s599_s26 = sshll.u32 %s785_s7, 3 }
   0xf   : > { %s269_s11 = scalar_lea.vmem %s778_s1, %s595_s8  ;;  %s263_s14 = scalar_lea.vmem %s777_s0, %s595_s8 }
  0x10   : > { %v674_v6 = vld [vmem:[%s269_s11] sm:$0xff]   ;;  %s275_s29 = scalar_lea.vmem %s783_s6, %s599_s26 }
  0x11   : > { %v675_v7 = vld [vmem:[%s263_s14] sm:$0xff]   ;;  %630 = vmatmul.mubr.msk.bf16.vlgmr.msra.gmra.mrb[0].mxu0 %vm306_vm2, %v674_v6 }
  0x12   : > { %638 = vmatmul.mubr.msk.bf16.vlgmr.msra.gmra.mrb[0].mxu1 %vm365_vm3, %v675_v7  ;;  %655 = vmatpush3.bf16.msra.mxu0 %v652_v10 }
  0x13   : > { %657 = vmatprep.subr.bf16.mxu0 %v656_v13 }
  0x16   : > { %659 = vmatpush3.bf16.msra.mxu0 %v656_v13 }
  0xe4   : > { %v344_v15 = vpop.f32.mrb[0].mxu0 }
  0xe5   : > { %v407_v16 = vpop.f32.mrb[0].mxu1  ;;  %v631_v18 = vpop.f32.mrb[1].mxu0 }
  0xe6   : > { %v408_v20 = vadd.f32 %v407_v16, %v344_v15  ;;  %v639_v21 = vpop.f32.mrb[1].mxu1  ;;  %v347_v22 = vpop.f32.mrb[2].mxu0 }
  0xe7   : > { %v410_v23 = vpop.f32.mrb[2].mxu1  ;;  %v632_v24 = vpop.f32.mrb[3].mxu0 }
  0xe8   : > { %v421_v25 = vadd.f32 %v608_v17, %v408_v20  ;;  %v411_v26 = vadd.f32 %v410_v23, %v347_v22  ;;  %v640_v27 = vpop.f32.mrb[3].mxu1 }
  0xea   : > { %v426_v28 = vmax.f32 %v421_v25, 0.0  ;;  %v422_v29 = vadd.f32 %v608_v17, %v411_v26 }
  0xec   : > { %v427_v30 = vmax.f32 %v422_v29, 0.0  ;;  %v430_v31 = vsel %vm425_vm4, %v426_v28, 0.0  ;;  %v428_v32 = vsel %vm425_vm4, %v426_v28, %v421_v25 }
  0xed   : > { %649 = vmatprep.mubr.msk.f32.mxu0 %vm306_vm2, %v430_v31 }
  0xee   : > { %v431_v33 = vsel %vm425_vm4, %v427_v30, 0.0  ;;  %v429_v34 = vsel %vm425_vm4, %v427_v30, %v422_v29 }
  0xef   : > { %650 = vmatmul.mubr.msk.f32.vlgmr.msra.gmra.mrb[4].mxu0 %vm306_vm2, %v431_v33 }
 0x1c2   : > { %v651_v35 = vpop.f32.mrb[4].mxu0 }
 0x1c3   : > { %v518_v36 = vadd.f32 %v651_v35, %v429_v34  ;;  %v508_v37 = vpop.f32.mrb[5].mxu0 }
 0x1c4   : > { %v517_v38 = vadd.f32 %v508_v37, %v428_v32 }
 0x1c5   : > { %520 = vst.msk [vmem:[%s275_s29 + $0x8] sm:$0xff] %vm306_vm2, %v518_v36 }
 0x1c6   : > { %519 = vst.msk [vmem:[%s275_s29] sm:$0xff] %vm306_vm2, %v517_v38 }
 0x1c7 PF: > { %s16_s21 = sadd.s32 1, %s682_s21  }
 0x1c8   : > { %p13_p4 = scmp.ge.s32.totalorder %s16_s21, 4  }
 0x1ca   :  { %15 = sbr.rel (!%p13_p4) target bundleno = 1 (0x1), region = 77 }

</bundles_post_ra>
